<compile_context>
chip_gen: v6e
topology: v6e:2x2x1
jax: 0.10.0
libtpu: 0.0.40
codegen_flags: <defaults>
</compile_context>

<pallas_src>
import functools

import jax
import jax.numpy as jnp
from jax.experimental import pallas as pl
from jax.experimental.pallas import tpu as pltpu

S = 15.0
M = 0.4
GAMMA = 2.0          # compile-time constant 2 -> (1-p)**2 is a single multiply
EPS = 1e-10
WAYS = 10


def _addmargin_focal_kernel(cos_ref, label_ref, out_ref, acc_ref, *,
                            b_total, inv_b):
    pid = pl.program_id(0)
    nsteps = pl.num_programs(0)

    @pl.when(pid == 0)
    def _init():
        acc_ref[...] = jnp.zeros_like(acc_ref)

    cosv = cos_ref[...].astype(jnp.float32)          # (TB, W), bf16 upcast here
    labels = label_ref[...]                          # (TB, 1) i32
    tb, w = cosv.shape

    # one-hot built from a 2-D iota (TPU requires >= 2D iota)
    col = jax.lax.broadcasted_iota(jnp.int32, (tb, w), dimension=1)
    one_hot = (col == labels).astype(jnp.float32)    # (TB, W)

    # additive-margin logits, scaled, plus the eps FocalLoss adds to the logits
    metric = S * (cosv - M * one_hot) + EPS          # (TB, W)

    # per-row cross-entropy via a stable logsumexp
    mx = jnp.max(metric, axis=-1, keepdims=True)
    lse = mx + jnp.log(jnp.sum(jnp.exp(metric - mx), axis=-1, keepdims=True))
    correct = jnp.sum(one_hot * metric, axis=-1, keepdims=True)
    ce = lse - correct                               # (TB, 1)

    # mask rows past the true batch size (last partial tile is zero-padded out)
    row = pid * tb + jax.lax.broadcasted_iota(jnp.int32, (tb, 1), dimension=0)
    ce = jnp.where(row < b_total, ce, 0.0)

    acc_ref[...] += jnp.sum(ce, axis=0, keepdims=True)   # (1,1) running sum

    @pl.when(pid == nsteps - 1)
    def _finalize():
        L = acc_ref[...] * inv_b                     # (1,1) mean cross-entropy
        p = jnp.exp(-L)
        omp = 1.0 - p
        out_ref[...] = (omp * omp) * L               # gamma == 2 -> one multiply


def _round_up(n, mult):
    return ((n + mult - 1) // mult) * mult


def _pick_tile_b(batch):
    # 8K rows stays inside v7x's 32 MiB default scoped VMEM (2 KiB/row incl.
    # double buffering and 128-lane padding); 128 MiB chips (v5e/v6e) take 16K.
    tile = 8192
    try:
        vmem = pltpu.get_tpu_info().vmem_capacity_bytes
        if vmem >= 100 * 1024 * 1024:
            tile = 16384
    except Exception:
        pass
    return min(tile, _round_up(max(batch, 1), 8))


def add_margin_loss(cosine, label, tile_b=None):
    """cosine: (B, WAYS) float (f32 or bf16), label: (B,) int -> scalar f32 loss."""
    batch, ways = cosine.shape
    if tile_b is None:
        tile_b = _pick_tile_b(batch)
    tile_b = _round_up(min(tile_b, _round_up(batch, 8)), 8)
    num_tiles = pl.cdiv(batch, tile_b)
    label2d = label.reshape(batch, 1).astype(jnp.int32)

    kernel = functools.partial(
        _addmargin_focal_kernel, b_total=batch, inv_b=1.0 / batch)

    # both inputs pad to 128 lanes in VMEM: 2 arrays x 2 buffers x 4 B = 2 KiB/row
    vmem_limit = max(16 * 1024 * 1024, tile_b * 2048 + (4 << 20))

    out = pl.pallas_call(
        kernel,
        out_shape=jax.ShapeDtypeStruct((1, 1), jnp.float32),
        grid_spec=pltpu.PrefetchScalarGridSpec(
            num_scalar_prefetch=0,
            grid=(num_tiles,),
            in_specs=[
                pl.BlockSpec((tile_b, ways), lambda i: (i, 0)),
                pl.BlockSpec((tile_b, 1), lambda i: (i, 0)),
            ],
            out_specs=pl.BlockSpec((1, 1), lambda i: (0, 0)),
            scratch_shapes=[pltpu.VMEM((1, 1), jnp.float32)],
        ),
        compiler_params=pltpu.CompilerParams(
            dimension_semantics=("arbitrary",),
            vmem_limit_bytes=vmem_limit,
        ),
    )(cosine, label2d)
    return out[0, 0]


def _reference(cosine, label):
    cosine = cosine.astype(jnp.float32)
    one_hot = jax.nn.one_hot(label, WAYS, dtype=jnp.float32)
    metric = S * (one_hot * (cosine - M) + (1.0 - one_hot) * cosine) + EPS
    lse = jax.scipy.special.logsumexp(metric, axis=-1)
    ce = lse - jnp.take_along_axis(metric, label[:, None], axis=-1)[:, 0]
    L = jnp.mean(ce)
    p = jnp.exp(-L)
    return (1.0 - p) ** GAMMA * L


if __name__ == "__main__":
    key = jax.random.PRNGKey(0)
    k_x, k_w, k_y = jax.random.split(key, 3)

    # small, deterministic synthetic inputs: batch=8, hidden=32, ways=10
    B, D = 8, 32
    x = jax.random.normal(k_x, (B, D), dtype=jnp.float32)
    w = jax.random.normal(k_w, (WAYS, D), dtype=jnp.float32)
    label = jax.random.randint(k_y, (B,), 0, WAYS, dtype=jnp.int32)

    # glue: cosine similarity (F.linear(F.normalize(x), F.normalize(w)))
    xn = x / jnp.linalg.norm(x, axis=-1, keepdims=True)
    wn = w / jnp.linalg.norm(w, axis=-1, keepdims=True)
    cos = xn @ wn.T                                   # (B, WAYS) f32

    # 1) float32 path, single tile
    loss = jax.block_until_ready(add_margin_loss(cos, label))
    ref = _reference(cos, label)
    assert jnp.allclose(loss, ref, rtol=1e-5, atol=1e-5), (loss, ref)

    # 2) bf16 input path (halves HBM read traffic; upcast happens in-kernel)
    cos_bf16 = cos.astype(jnp.bfloat16)
    loss_bf16 = jax.block_until_ready(add_margin_loss(cos_bf16, label))
    ref_bf16 = _reference(cos_bf16.astype(jnp.float32), label)
    assert jnp.allclose(loss_bf16, ref_bf16, rtol=1e-5, atol=1e-5), (loss_bf16, ref_bf16)

    # 3) multi-tile grid with a masked partial last tile (B=20, tile_b=8 -> 3 steps)
    B2 = 20
    k_x2, k_y2 = jax.random.split(k_x)
    x2 = jax.random.normal(k_x2, (B2, D), dtype=jnp.float32)
    label2 = jax.random.randint(k_y2, (B2,), 0, WAYS, dtype=jnp.int32)
    xn2 = x2 / jnp.linalg.norm(x2, axis=-1, keepdims=True)
    cos2 = xn2 @ wn.T
    loss2 = jax.block_until_ready(add_margin_loss(cos2, label2, tile_b=8))
    ref2 = _reference(cos2, label2)
    assert jnp.allclose(loss2, ref2, rtol=1e-5, atol=1e-5), (loss2, ref2)

    print("KERNEL_OK")
</pallas_src>

<mosaic_0001>
module attributes {stable_mosaic.version = 11 : i64} {
  func.func @_addmargin_focal_kernel(%arg0: i32, %arg1: memref<8x10xf32, #tpu.memory_space<vmem>>, %arg2: memref<8x1xi32, #tpu.memory_space<vmem>>, %arg3: memref<1x1xf32, #tpu.memory_space<vmem>>, %arg4: memref<1x1xf32, #tpu.memory_space<vmem>>) attributes {dimension_semantics = [#tpu.dimension_semantics<arbitrary>], iteration_bounds = array<i64: 1>, scalar_prefetch = 0 : i64, scratch_operands = 1 : i64, tpu.core_type = #tpu.core_type<tc>, window_params = [{transform_indices = @transform_0, window_bounds = array<i64: 8, 10>}, {transform_indices = @transform_1, window_bounds = array<i64: 8, 1>}, {pipeline_mode = #tpu.pipeline_mode<synchronous>, transform_indices = @transform_2, window_bounds = array<i64: 1, 1>}]} {
    %c0_i32 = arith.constant 0 : i32
    %0 = arith.cmpi eq, %arg0, %c0_i32 : i32
    %1 = arith.extui %0 : i1 to i32
    %c0_i32_0 = arith.constant 0 : i32
    %2 = arith.cmpi ne, %1, %c0_i32_0 : i32
    scf.if %2 {
      %cst_18 = arith.constant 0.000000e+00 : f32
      %46 = vector.broadcast %cst_18 : f32 to vector<1x1xf32>
      %c0_19 = arith.constant 0 : index
      %c0_20 = arith.constant 0 : index
      %47 = vector.load %arg4[%c0_19, %c0_20] : memref<1x1xf32, #tpu.memory_space<vmem>>, vector<1x1xf32>
      tpu.vector_store %arg4[%c0_19, %c0_20], %46 {strides = array<i32>} : memref<1x1xf32, #tpu.memory_space<vmem>>, vector<1x1xf32>,
    } else {
    }
    %c0 = arith.constant 0 : index
    %c0_1 = arith.constant 0 : index
    %3 = vector.load %arg1[%c0, %c0_1] : memref<8x10xf32, #tpu.memory_space<vmem>>, vector<8x10xf32>
    %c0_2 = arith.constant 0 : index
    %c0_3 = arith.constant 0 : index
    %4 = vector.load %arg2[%c0_2, %c0_3] : memref<8x1xi32, #tpu.memory_space<vmem>>, vector<8x1xi32>
    %5 = tpu.iota {dimensions = array<i32: 1>} : vector<8x10xi32>
    %6 = vector.broadcast %4 : vector<8x1xi32> to vector<8x10xi32>
    %7 = arith.cmpi eq, %5, %6 : vector<8x10xi32>
    %8 = arith.extui %7 : vector<8x10xi1> to vector<8x10xi32>
    %9 = arith.sitofp %8 : vector<8x10xi32> to vector<8x10xf32>
    %cst = arith.constant 4.000000e-01 : f32
    %10 = vector.broadcast %cst : f32 to vector<8x10xf32>
    %11 = arith.mulf %10, %9 : vector<8x10xf32>
    %12 = arith.subf %3, %11 : vector<8x10xf32>
    %cst_4 = arith.constant 1.500000e+01 : f32
    %13 = vector.broadcast %cst_4 : f32 to vector<8x10xf32>
    %14 = arith.mulf %13, %12 : vector<8x10xf32>
    %cst_5 = arith.constant 1.000000e-10 : f32
    %15 = vector.broadcast %cst_5 : f32 to vector<8x10xf32>
    %16 = arith.addf %14, %15 : vector<8x10xf32>
    %cst_6 = arith.constant dense<0xFF800000> : vector<8xf32>
    %17 = vector.multi_reduction <maximumf>, %16, %cst_6 [1] : vector<8x10xf32> to vector<8xf32>
    %18 = vector.shape_cast %17 : vector<8xf32> to vector<8x1xf32>
    %19 = vector.broadcast %18 : vector<8x1xf32> to vector<8x10xf32>
    %20 = arith.subf %16, %19 : vector<8x10xf32>
    %21 = math.exp %20 : vector<8x10xf32>
    %cst_7 = arith.constant dense<0.000000e+00> : vector<8xf32>
    %22 = vector.multi_reduction <add>, %21, %cst_7 [1] : vector<8x10xf32> to vector<8xf32>
    %23 = vector.shape_cast %22 : vector<8xf32> to vector<8x1xf32>
    %24 = math.log %23 : vector<8x1xf32>
    %25 = arith.addf %18, %24 : vector<8x1xf32>
    %26 = arith.mulf %9, %16 : vector<8x10xf32>
    %cst_8 = arith.constant dense<0.000000e+00> : vector<8xf32>
    %27 = vector.multi_reduction <add>, %26, %cst_8 [1] : vector<8x10xf32> to vector<8xf32>
    %28 = vector.shape_cast %27 : vector<8xf32> to vector<8x1xf32>
    %29 = arith.subf %25, %28 : vector<8x1xf32>
    %c8_i32 = arith.constant 8 : i32
    %30 = arith.muli %arg0, %c8_i32 : i32
    %31 = tpu.iota {dimensions = array<i32: 0>} : vector<8x1xi32>
    %32 = vector.broadcast %30 : i32 to vector<8x1xi32>
    %33 = arith.addi %32, %31 : vector<8x1xi32>
    %c8_i32_9 = arith.constant 8 : i32
    %34 = vector.broadcast %c8_i32_9 : i32 to vector<8x1xi32>
    %35 = arith.cmpi slt, %33, %34 : vector<8x1xi32>
    %cst_10 = arith.constant 0.000000e+00 : f32
    %36 = vector.broadcast %cst_10 : f32 to vector<8x1xf32>
    %37 = arith.select %35, %29, %36 : vector<8x1xi1>, vector<8x1xf32>
    %c0_11 = arith.constant 0 : index
    %c0_12 = arith.constant 0 : index
    %38 = vector.load %arg4[%c0_11, %c0_12] : memref<1x1xf32, #tpu.memory_space<vmem>>, vector<1x1xf32>
    %cst_13 = arith.constant dense<0.000000e+00> : vector<1xf32>
    %39 = vector.multi_reduction <add>, %37, %cst_13 [0] : vector<8x1xf32> to vector<1xf32>
    %40 = vector.shape_cast %39 : vector<1xf32> to vector<1x1xf32>
    %41 = arith.addf %38, %40 : vector<1x1xf32>
    %c0_14 = arith.constant 0 : index
    %c0_15 = arith.constant 0 : index
    %42 = vector.load %arg4[%c0_14, %c0_15] : memref<1x1xf32, #tpu.memory_space<vmem>>, vector<1x1xf32>
    tpu.vector_store %arg4[%c0_14, %c0_15], %41 {strides = array<i32>} : memref<1x1xf32, #tpu.memory_space<vmem>>, vector<1x1xf32>,
    %c0_i32_16 = arith.constant 0 : i32
    %43 = arith.cmpi eq, %arg0, %c0_i32_16 : i32
    %44 = arith.extui %43 : i1 to i32
    %c0_i32_17 = arith.constant 0 : i32
    %45 = arith.cmpi ne, %44, %c0_i32_17 : i32
    scf.if %45 {
      %c0_18 = arith.constant 0 : index
      %c0_19 = arith.constant 0 : index
      %46 = vector.load %arg4[%c0_18, %c0_19] : memref<1x1xf32, #tpu.memory_space<vmem>>, vector<1x1xf32>
      %cst_20 = arith.constant 1.250000e-01 : f32
      %47 = vector.broadcast %cst_20 : f32 to vector<1x1xf32>
      %48 = arith.mulf %46, %47 : vector<1x1xf32>
      %cst_21 = arith.constant 0.000000e+00 : f32
      %49 = vector.broadcast %cst_21 : f32 to vector<1x1xf32>
      %50 = arith.subf %49, %48 : vector<1x1xf32>
      %51 = math.exp %50 : vector<1x1xf32>
      %cst_22 = arith.constant 1.000000e+00 : f32
      %52 = vector.broadcast %cst_22 : f32 to vector<1x1xf32>
      %53 = arith.subf %52, %51 : vector<1x1xf32>
      %54 = arith.mulf %53, %53 : vector<1x1xf32>
      %55 = arith.mulf %54, %48 : vector<1x1xf32>
      %c0_23 = arith.constant 0 : index
      %c0_24 = arith.constant 0 : index
      %56 = vector.load %arg3[%c0_23, %c0_24] : memref<1x1xf32, #tpu.memory_space<vmem>>, vector<1x1xf32>
      tpu.vector_store %arg3[%c0_23, %c0_24], %55 {strides = array<i32>} : memref<1x1xf32, #tpu.memory_space<vmem>>, vector<1x1xf32>,
    } else {
    }
    return
  }
  func.func @transform_0(%arg0: i32) -> (i32, i32) {
    %c0_i32 = arith.constant 0 : i32
    %c0_i32_0 = arith.constant 0 : i32
    return %arg0, %c0_i32 : i32, i32
  }
  func.func @transform_1(%arg0: i32) -> (i32, i32) {
    %c0_i32 = arith.constant 0 : i32
    %c0_i32_0 = arith.constant 0 : i32
    return %arg0, %c0_i32 : i32, i32
  }
  func.func @transform_2(%arg0: i32) -> (i32, i32) {
    %c0_i32 = arith.constant 0 : i32
    %c0_i32_0 = arith.constant 0 : i32
    %c0_i32_1 = arith.constant 0 : i32
    return %c0_i32, %c0_i32_0 : i32, i32
  }
}

</mosaic_0001>

<bundles_post_ra>
// kernel: tpu_custom_call.1
= control target key start
LH: loop header
LB: loop body
LE: loop exit
PB: predicated region body
PF: predicated region fallthrough
CT: control target
= control target key end

     0   :  { %vm16_vm0 = vcmask 0   ;;  %v126_v1 = vmov 0   ;;  %v127_v2 = vmov 0.0   ;;  %s156_s0 = inlined_call_operand.vmem [shape: f32[8,10], index: 0, kind: input, shape index: {}]   ;;  %s157_s1 = inlined_call_operand.vmem [shape: s32[8,1], index: 1, kind: input, shape index: {}]   ;;  %s158_s2 = inlined_call_operand.hbm [shape: f32[1,1], index: 2, kind: output, shape index: {}]  }
   0x1   :  { %v19_v0 = vld [vmem:[%s157_s1] sm:$0xff]  ;;  %97 = vset.pattern.permute.xlu0 %v126_v1  ;;  %17 = vst.msk [vmem:[#allocation2] sm:$0x1] %vm16_vm0, %v127_v2 }
   0x2   :  { %7 = vsyncpa [#allocation4], 0  ;;  %23 = vperm.xlu0 %97, %v19_v0   ;;  %v20_v3 = vlaneseq  ;;  %v18_v6 = vld [vmem:[%s156_s0] sm:$0xff]  ;;  %vm32_vm2 = vcmask 80896   ;;  %s128_s0 = smov [#allocation3]  }
   0x3   :  { %s85_s1 = sshll.u32 %s128_s0, 4  ;;  %s86_s1 = int_to_ptr.vmem [resolvable:$true] %s85_s1 }
   0x4   :  { %v21_v4 = vand.u32 127, %v20_v3  ;;  %s104_s13 = scalar_lea.vmem %s86_s1, 16  ;;  %s108_s14 = scalar_lea.vmem %s86_s1, 32 }
   0x5   :  { %p105_p0 = scmp.ne.s32.totalorder %s86_s1, %s104_s13  ;;  %p109_p1 = scmp.lt.s32.totalorder %s86_s1, %s86_s1 }
   0x6   :  { %p110_p2 = scmp.lt.s32.totalorder %s108_s14, %s104_s13 }
   0x8   :  { %v57_v31 = vld [vmem:[#allocation2] sm:$0x1]  ;;  %p111_p3 = por %p110_p2, %p109_p1 }
   0xa   :  { %p112_p4 = pnand %p111_p3, %p105_p0 }
  0x7d   :  { %v24_v5 = vpop.permute.xlu0 %23 }
  0x7e   :  { %vm25_vm1 = vcmp.eq.s32.totalorder %v21_v4, %v24_v5 }
  0x7f   :  { %v93_v7 = vsel %vm25_vm1, 1.0, %v127_v2 }
  0x80   :  { %v28_v8 = vmul.f32 0.4, %v93_v7 }
  0x82   :  { %v29_v9 = vsub.f32 %v18_v6, %v28_v8 }
  0x84   :  { %v30_v10 = vmul.f32 15.0, %v29_v9 }
  0x86   :  { %v31_v11 = vadd.f32 1e-10, %v30_v10 }
  0x88   :  { %v33_v12 = vsel %vm32_vm2, %v31_v11, -inf  ;;  %v45_v18 = vmul.f32 %v93_v7, %v31_v11 }
  0x89   :  { %34 = vmax.xlane.f32.xlu0 %v33_v12 }
  0x8a   :  { %v46_v19 = vsel %vm32_vm2, %v45_v18, 0.0 }
 0x112   :  { %v35_v13 = vpop.xlane.xlu0 %34 }
 0x113   :  { %v36_v14 = vsub.f32 %v31_v11, %v35_v13 }
 0x115   :  { %v37_v15 = vmul.f32 1.442695, %v36_v14 }
 0x117   :  { %98 = vpow2.f32 %v37_v15 }
 0x124   :  { %v99_v16 = vpop.eup %98 }
 0x125   :  { %v39_v17 = vsel %vm32_vm2, %v99_v16, 0.0 }
 0x126   :  { %40 = vadd.xlane.f32.xlu1 %v39_v17 }
 0x12a   :  { %47 = vadd.xlane.f32.xlu1 %v46_v19 }
 0x1af   :  { %v41_v20 = vpop.xlane.xlu1 %40 }
 0x1b0   :  { %100 = vlog2.f32 %v41_v20 }
 0x1b3   :  { %v48_v24 = vpop.xlane.xlu1 %47 }
 0x1bd   :  { %v101_v21 = vpop.eup %100 }
 0x1be   :  { %v43_v22 = vmul.f32 0.6931472, %v101_v21 }
 0x1c0   :  { %v44_v23 = vadd.f32 %v43_v22, %v35_v13 }
 0x1c2   :  { %v49_v25 = vsub.f32 %v44_v23, %v48_v24 }
 0x1c4   :  { %v58_v26 = vrot.slane %v49_v25, 4 }
 0x1c6   :  { %v59_v27 = vadd.f32 %v58_v26, %v49_v25 }
 0x1c8   :  { %v60_v28 = vrot.slane %v59_v27, 2 }
 0x1ca   :  { %v61_v29 = vadd.f32 %v60_v28, %v59_v27 }
 0x1cc   :  { %v62_v30 = vrot.slane %v61_v29, 1 }
 0x1ce   :  { %v63_v32 = vadd.f32 %v62_v30, %v61_v29 }
 0x1d0   :  { %v64_v33 = vadd.f32 %v63_v32, %v57_v31 }
 0x1d2   :  { %66 = vst.msk [vmem:[#allocation2] sm:$0x1] %vm16_vm0, %v64_v33 }
 0x1d9   :  { %v70_v34 = vld [vmem:[#allocation2] sm:$0x1] }
 0x1da   :  { %v71_v35 = vmul.f32 0.125, %v70_v34 }
 0x1dc   :  { %v72_v36 = vsub.f32 0.0, %v71_v35 }
 0x1de   :  { %v73_v37 = vmul.f32 1.442695, %v72_v36 }
 0x1e0   :  { %102 = vpow2.f32 %v73_v37 }
 0x1ed   :  { %v103_v38 = vpop.eup %102 }
 0x1ee   :  { %v75_v39 = vsub.f32 1.0, %v103_v38 }
 0x1f0   :  { %v76_v40 = vmul.f32 %v75_v39, %v75_v39 }
 0x1f2   :  { %v77_v41 = vmul.f32 %v76_v40, %v71_v35 }
 0x1f4   :  { %78 = vst.msk [vmem:[#allocation3] sm:$0x1] %vm16_vm0, %v77_v41 }
 0x1f5   :  { %115 = shalt.err (!%p112_p4)
}
 0x1f6   :  { %88 = dma.vmem_to_hbm [thread:$0]  %s86_s1, 16, %s158_s2, [#allocation4]  }
 0x1f7   :  { %124 = dma.done.wait [#allocation4], 16  }
 0x1f8   :  { %125 = vsyncadd [#allocation4], 4294967280 }
 0x1f9   :  { %92 = vsyncpa [#allocation4], 1 }

</bundles_post_ra>
